<compile_context>
chip_gen: v5e
topology: v5e:2x2
jax: 0.10.0
libtpu: 0.0.40
codegen_flags: <defaults>
</compile_context>

<pallas_src>
import jax
import jax.numpy as jnp
import numpy as np
from jax.experimental import pallas as pl
from jax.experimental.pallas import tpu as pltpu

_MIB = 1024 * 1024


def _round_up(x, m):
    return ((x + m - 1) // m) * m


# ---------------------------------------------------------------------------
# Kernel
# ---------------------------------------------------------------------------
def _encoder_kernel(arg_ref, evt_ref, emb_ref, w_ref, b_ref, out_ref, msk_ref):
    """relu(([arg_mask; evt_mask] @ sent_embeds) @ W + b), mask-first order.

    arg_ref : (Bb, Ma, L)   bf16
    evt_ref : (Bb, Me, L)   bf16
    emb_ref : (Bb, L,  E)   bf16
    w_ref   : (E,  Cp)      bf16   (resident across grid)
    b_ref   : (1,  Cp)      f32    (resident across grid)
    out_ref : (Bb, Mp, Cp)  f32
    msk_ref : (Bb*Mp, E)    bf16   VMEM scratch: fused-M mention embeddings
    """
    Bb, Ma, _ = arg_ref.shape
    Me = evt_ref.shape[1]
    E = emb_ref.shape[2]
    Mp = out_ref.shape[1]
    Cp = w_ref.shape[1]
    Mtot = Ma + Me

    # Stage 1 (mask-first): tiny per-batch (M, L) @ (L, E) dots, bf16 x bf16
    # with f32 accumulation.  Statically unrolled over the batch block so every
    # dot is visible to the scheduler; results land in the fused-M scratch.
    for i in range(Bb):
        emb_i = emb_ref[i]                                      # (L, E)
        a = jnp.dot(arg_ref[i], emb_i, preferred_element_type=jnp.float32)
        e = jnp.dot(evt_ref[i], emb_i, preferred_element_type=jnp.float32)
        base = i * Mp
        msk_ref[base:base + Ma, :] = a.astype(jnp.bfloat16)
        msk_ref[base + Ma:base + Mtot, :] = e.astype(jnp.bfloat16)
        if Mtot != Mp:                                          # zero the pad rows
            msk_ref[base + Mtot:base + Mp, :] = jnp.zeros(
                (Mp - Mtot, E), jnp.bfloat16)

    # Stage 2: ONE fused MXU matmul with M = Bb*Mp: (Bb*Mp, E) @ (E, Cp),
    # bf16 operands, f32 accumulation, lane-dense Cp output.
    y = jnp.dot(msk_ref[...], w_ref[...], preferred_element_type=jnp.float32)
    y = y.reshape(Bb, Mp, Cp) + b_ref[...]
    out_ref[...] = jnp.maximum(y, 0.0).astype(out_ref.dtype)


# ---------------------------------------------------------------------------
# Generation-aware sizing
# ---------------------------------------------------------------------------
def _vmem_capacity_bytes():
    try:
        info = pltpu.get_tpu_info()
        cap = getattr(info, "vmem_capacity_bytes", None)
        if cap:
            return int(cap)
    except Exception:
        pass
    return 64 * _MIB          # conservative default (v7x-sized TensorCore)


def _generation_config():
    cap = _vmem_capacity_bytes()
    if cap <= 96 * _MIB:
        # v7x-class TC (64 MiB VMEM): leave headroom, >=2 steps per TensorCore.
        return dict(vmem_budget=16 * _MIB, vmem_limit=40 * _MIB, min_steps=4)
    # v5e / v6e (128 MiB VMEM): big blocks amortize ~0.35us/step grid overhead.
    return dict(vmem_budget=56 * _MIB, vmem_limit=96 * _MIB, min_steps=2)


def _kernel_vmem_bytes(bb, Ma, Me, L, E, Mp, Cp):
    streamed = bb * ((Ma + Me) * L * 2 + L * E * 2 + Mp * Cp * 4)  # in + out blocks
    resident = E * Cp * 2 + Cp * 4                                 # W, b
    scratch = bb * Mp * E * 2                                      # masked bf16 scratch
    tmp = bb * Mp * Cp * 4                                         # stage-2 f32 value
    return 2 * streamed + resident + scratch + tmp                 # double-buffered I/O


def _pick_batch_block(B, Ma, Me, L, E, Mp, Cp, vmem_budget, min_steps):
    """Fewest grid steps (largest batch block) that fits the VMEM budget and
    keeps at least `min_steps` steps (so megacore/pipelining stay fed)."""
    req_steps = max(1, min(min_steps, B))
    best_bb, best_steps = 1, B
    for steps in range(req_steps, B + 1):
        bb = -(-B // steps)                  # smallest block reaching this step count
        real_steps = -(-B // bb)
        if real_steps < req_steps:
            continue
        if _kernel_vmem_bytes(bb, Ma, Me, L, E, Mp, Cp) > vmem_budget:
            continue
        if real_steps < best_steps or (real_steps == best_steps and bb < best_bb):
            best_bb, best_steps = bb, real_steps
    return best_bb


# ---------------------------------------------------------------------------
# Wrapper
# ---------------------------------------------------------------------------
def mention_compress_fused(arg_mask, evt_mask, sent_embeds,
                           w_pad_bf16, b_pad_f32, out_dim):
    """relu(bmm(mask, sent_embeds) @ W + b) for arg+evt masks in one kernel."""
    B, Ma, L = arg_mask.shape
    Be, Me, Le = evt_mask.shape
    Bs, Ls, E = sent_embeds.shape
    Ew, Cp = w_pad_bf16.shape
    assert B == Be == Bs and L == Le == Ls and E == Ew

    Mtot = Ma + Me
    Mp = _round_up(Mtot, 16)          # bf16 sublane packing for the fused-M rows

    # bf16 heavy streams (exact for 0/1 masks); accumulation stays f32 in-kernel.
    arg_bf = arg_mask.astype(jnp.bfloat16)
    evt_bf = evt_mask.astype(jnp.bfloat16)
    emb_bf = sent_embeds.astype(jnp.bfloat16)

    cfg = _generation_config()
    Bb = _pick_batch_block(B, Ma, Me, L, E, Mp, Cp,
                           cfg["vmem_budget"], cfg["min_steps"])
    grid = (pl.cdiv(B, Bb),)

    flops = 2 * B * (Mtot * L * E + Mp * E * Cp)        # mask-first FLOP count
    bytes_accessed = (arg_bf.size * 2 + evt_bf.size * 2 + emb_bf.size * 2 +
                      w_pad_bf16.size * 2 + b_pad_f32.size * 4 + B * Mp * Cp * 4)

    out = pl.pallas_call(
        _encoder_kernel,
        out_shape=jax.ShapeDtypeStruct((B, Mp, Cp), jnp.float32),
        grid_spec=pltpu.PrefetchScalarGridSpec(
            num_scalar_prefetch=0,
            grid=grid,
            in_specs=[
                pl.BlockSpec((Bb, Ma, L), lambda bi: (bi, 0, 0)),
                pl.BlockSpec((Bb, Me, L), lambda bi: (bi, 0, 0)),
                pl.BlockSpec((Bb, L, E), lambda bi: (bi, 0, 0)),
                pl.BlockSpec((E, Cp), lambda bi: (0, 0)),     # weights stay resident
                pl.BlockSpec((1, Cp), lambda bi: (0, 0)),     # bias stays resident
            ],
            out_specs=pl.BlockSpec((Bb, Mp, Cp), lambda bi: (bi, 0, 0)),
            scratch_shapes=[pltpu.VMEM((Bb * Mp, E), jnp.bfloat16)],
        ),
        compiler_params=pltpu.CompilerParams(
            dimension_semantics=("parallel",),
            vmem_limit_bytes=cfg["vmem_limit"],
        ),
        cost_estimate=pl.CostEstimate(
            flops=flops, transcendentals=0, bytes_accessed=bytes_accessed),
    )(arg_bf, evt_bf, emb_bf, w_pad_bf16, b_pad_f32)

    # Padded Mp rows / Cp lanes are never exposed: always slice here.
    arg_out = out[:, :Ma, :out_dim]
    evt_out = out[:, Ma:Mtot, :out_dim]
    return arg_out, evt_out


def prepare_params(params):
    """Pad + cast the compress layer ONCE at setup time (not per forward)."""
    w = params["compress_w"]          # (E, C)
    b = params["compress_b"]          # (1, C)
    _, C = w.shape
    Cp = _round_up(C, 128)            # lane-dense / MXU-aligned output width
    if Cp != C:
        w = jnp.pad(w, ((0, 0), (0, Cp - C)))
        b = jnp.pad(b, ((0, 0), (0, Cp - C)))
    prepared = dict(params)
    prepared["compress_w_padded"] = w.astype(jnp.bfloat16)
    prepared["compress_b_padded"] = b.astype(jnp.float32)
    prepared["compress_out_dim"] = C
    return prepared


def encoder_layer_forward(sent_token_ids, arg_mask, evt_mask, prepared):
    """Mirrors EncoderLayer.forward semantics."""
    tok_emb = prepared["token_embedding"]      # (V, E)
    pos_emb = prepared["position_embedding"]   # (L, E)
    # "BERT" substitute: deterministic embedding lookup (glue, not hot path).
    sent_embeds = (tok_emb[sent_token_ids] + pos_emb[None, :, :]).astype(jnp.float32)
    return mention_compress_fused(
        arg_mask, evt_mask, sent_embeds,
        prepared["compress_w_padded"], prepared["compress_b_padded"],
        prepared["compress_out_dim"])


# ---------------------------------------------------------------------------
# References
# ---------------------------------------------------------------------------
def _reference(sent_token_ids, arg_mask, evt_mask, params, quantize=False):
    tok_emb = params["token_embedding"]
    pos_emb = params["position_embedding"]
    w = params["compress_w"]
    b = params["compress_b"]
    sent = (tok_emb[sent_token_ids] + pos_emb[None, :, :]).astype(jnp.float32)

    if quantize:      # mirror the kernel's bf16-operand / f32-accumulate chain
        def q(x):
            return x.astype(jnp.bfloat16).astype(jnp.float32)
        sent_q = q(sent)
        w_q = q(w)

        def mention(mask):
            masked = jnp.einsum("bml,ble->bme", q(mask), sent_q)   # stage 1
            masked = q(masked)                                     # bf16 scratch
            return jnp.maximum(masked @ w_q + b, 0.0)              # stage 2
        return mention(arg_mask), mention(evt_mask)

    def mention(mask):
        return jnp.maximum(jnp.einsum("bml,ble->bme", mask, sent) @ w + b, 0.0)
    return mention(arg_mask), mention(evt_mask)


if __name__ == "__main__":
    # Small shapes consistent with the module's forward.
    B = 2           # batch
    L = 16          # sentence (token) length
    E = 32          # embed_dim (stand-in for 768)
    C = 16          # compressd_embed_dim (stand-in for 500)
    M_ROLE = 8      # max_role_len
    M_EVT = 4       # event mentions per sample
    VOCAB = 100

    key = jax.random.PRNGKey(0)
    k1, k2, k3, k4, k5, k6, k7 = jax.random.split(key, 7)

    params = {
        "token_embedding": jax.random.normal(k1, (VOCAB, E), jnp.float32) * 0.02,
        "position_embedding": jax.random.normal(k2, (L, E), jnp.float32) * 0.02,
        "compress_w": jax.random.normal(k3, (E, C), jnp.float32) / np.sqrt(E),
        "compress_b": jax.random.normal(k4, (1, C), jnp.float32) * 0.01,
    }
    prepared = prepare_params(params)

    sent_token_ids = jax.random.randint(k5, (B, L), 0, VOCAB)
    arg_mask = jax.random.uniform(k6, (B, M_ROLE, L), jnp.float32)
    evt_mask = jax.random.uniform(k7, (B, M_EVT, L), jnp.float32)

    arg_out, evt_out = encoder_layer_forward(sent_token_ids, arg_mask, evt_mask, prepared)
    jax.block_until_ready((arg_out, evt_out))

    # Tight check against a reference that applies the same bf16 quantization
    # chain (isolates kernel math: bmm -> Linear -> ReLU, mask-first order).
    arg_q, evt_q = _reference(sent_token_ids, arg_mask, evt_mask, params, quantize=True)
    np.testing.assert_allclose(np.asarray(arg_out), np.asarray(arg_q), rtol=1e-3, atol=1e-4)
    np.testing.assert_allclose(np.asarray(evt_out), np.asarray(evt_q), rtol=1e-3, atol=1e-4)

    # Loose check against the full-f32 reference (documents bf16 quantization error).
    arg_ref, evt_ref = _reference(sent_token_ids, arg_mask, evt_mask, params)
    np.testing.assert_allclose(np.asarray(arg_out), np.asarray(arg_ref), rtol=5e-2, atol=1e-2)
    np.testing.assert_allclose(np.asarray(evt_out), np.asarray(evt_ref), rtol=5e-2, atol=1e-2)

    print("KERNEL_OK")
</pallas_src>

<mosaic_0001>
module attributes {stable_mosaic.version = 11 : i64} {
  func.func @_encoder_kernel(%arg0: i32, %arg1: memref<1x8x16xbf16, #tpu.memory_space<vmem>>, %arg2: memref<1x4x16xbf16, #tpu.memory_space<vmem>>, %arg3: memref<1x16x32xbf16, #tpu.memory_space<vmem>>, %arg4: memref<32x128xbf16, #tpu.memory_space<vmem>>, %arg5: memref<1x128xf32, #tpu.memory_space<vmem>>, %arg6: memref<1x16x128xf32, #tpu.memory_space<vmem>>, %arg7: memref<16x32xbf16, #tpu.memory_space<vmem>>) attributes {dimension_semantics = [#tpu.dimension_semantics<parallel>], iteration_bounds = array<i64: 2>, scalar_prefetch = 0 : i64, scratch_operands = 1 : i64, tpu.core_type = #tpu.core_type<tc>, window_params = [{transform_indices = @transform_0, window_bounds = array<i64: 1, 8, 16>}, {transform_indices = @transform_1, window_bounds = array<i64: 1, 4, 16>}, {transform_indices = @transform_2, window_bounds = array<i64: 1, 16, 32>}, {pipeline_mode = #tpu.pipeline_mode<synchronous>, transform_indices = @transform_3, window_bounds = array<i64: 32, 128>}, {pipeline_mode = #tpu.pipeline_mode<synchronous>, transform_indices = @transform_4, window_bounds = array<i64: 1, 128>}, {transform_indices = @transform_5, window_bounds = array<i64: 1, 16, 128>}]} {
    %c0 = arith.constant 0 : index
    %c0_0 = arith.constant 0 : index
    %c0_1 = arith.constant 0 : index
    %0 = vector.load %arg3[%c0, %c0_0, %c0_1] : memref<1x16x32xbf16, #tpu.memory_space<vmem>>, vector<1x16x32xbf16>
    %1 = vector.shape_cast %0 : vector<1x16x32xbf16> to vector<16x32xbf16>
    %c0_2 = arith.constant 0 : index
    %c0_3 = arith.constant 0 : index
    %c0_4 = arith.constant 0 : index
    %2 = vector.load %arg1[%c0_2, %c0_3, %c0_4] : memref<1x8x16xbf16, #tpu.memory_space<vmem>>, vector<1x8x16xbf16>
    %3 = vector.shape_cast %2 : vector<1x8x16xbf16> to vector<8x16xbf16>
    %cst = arith.constant dense<0.000000e+00> : vector<8x32xf32>
    %4 = tpu.matmul %3, %1, %cst {dimension_numbers = #tpu.dot_dimension_numbers<[1], [0], [0], [1], [0, 0, 1, 1], [], []>} : vector<8x16xbf16>, vector<16x32xbf16>, vector<8x32xf32> -> vector<8x32xf32>
    %c0_5 = arith.constant 0 : index
    %c0_6 = arith.constant 0 : index
    %c0_7 = arith.constant 0 : index
    %5 = vector.load %arg2[%c0_5, %c0_6, %c0_7] : memref<1x4x16xbf16, #tpu.memory_space<vmem>>, vector<1x4x16xbf16>
    %6 = vector.shape_cast %5 : vector<1x4x16xbf16> to vector<4x16xbf16>
    %cst_8 = arith.constant dense<0.000000e+00> : vector<4x32xf32>
    %7 = tpu.matmul %6, %1, %cst_8 {dimension_numbers = #tpu.dot_dimension_numbers<[1], [0], [0], [1], [0, 0, 1, 1], [], []>} : vector<4x16xbf16>, vector<16x32xbf16>, vector<4x32xf32> -> vector<4x32xf32>
    %8 = arith.truncf %4 : vector<8x32xf32> to vector<8x32xbf16>
    %c0_9 = arith.constant 0 : index
    %c0_10 = arith.constant 0 : index
    %9 = vector.load %arg7[%c0_9, %c0_10] : memref<16x32xbf16, #tpu.memory_space<vmem>>, vector<8x32xbf16>
    tpu.vector_store %arg7[%c0_9, %c0_10], %8 {strides = array<i32>} : memref<16x32xbf16, #tpu.memory_space<vmem>>, vector<8x32xbf16>,
    %10 = arith.truncf %7 : vector<4x32xf32> to vector<4x32xbf16>
    %c8 = arith.constant 8 : index
    %c0_11 = arith.constant 0 : index
    %11 = vector.load %arg7[%c8, %c0_11] : memref<16x32xbf16, #tpu.memory_space<vmem>>, vector<4x32xbf16>
    tpu.vector_store %arg7[%c8, %c0_11], %10 {strides = array<i32>} : memref<16x32xbf16, #tpu.memory_space<vmem>>, vector<4x32xbf16>,
    %cst_12 = arith.constant 0.000000e+00 : bf16
    %12 = vector.broadcast %cst_12 : bf16 to vector<4x32xbf16>
    %c12 = arith.constant 12 : index
    %c0_13 = arith.constant 0 : index
    %13 = vector.load %arg7[%c12, %c0_13] : memref<16x32xbf16, #tpu.memory_space<vmem>>, vector<4x32xbf16>
    tpu.vector_store %arg7[%c12, %c0_13], %12 {strides = array<i32>} : memref<16x32xbf16, #tpu.memory_space<vmem>>, vector<4x32xbf16>,
    %c0_14 = arith.constant 0 : index
    %c0_15 = arith.constant 0 : index
    %14 = vector.load %arg7[%c0_14, %c0_15] : memref<16x32xbf16, #tpu.memory_space<vmem>>, vector<16x32xbf16>
    %c0_16 = arith.constant 0 : index
    %c0_17 = arith.constant 0 : index
    %15 = vector.load %arg4[%c0_16, %c0_17] : memref<32x128xbf16, #tpu.memory_space<vmem>>, vector<32x128xbf16>
    %cst_18 = arith.constant dense<0.000000e+00> : vector<16x128xf32>
    %16 = tpu.matmul %14, %15, %cst_18 {dimension_numbers = #tpu.dot_dimension_numbers<[1], [0], [0], [1], [0, 0, 1, 1], [], []>} : vector<16x32xbf16>, vector<32x128xbf16>, vector<16x128xf32> -> vector<16x128xf32>
    %17 = vector.shape_cast %16 : vector<16x128xf32> to vector<1x16x128xf32>
    %c0_19 = arith.constant 0 : index
    %c0_20 = arith.constant 0 : index
    %18 = vector.load %arg5[%c0_19, %c0_20] : memref<1x128xf32, #tpu.memory_space<vmem>>, vector<1x128xf32>
    %19 = vector.shape_cast %18 : vector<1x128xf32> to vector<1x1x128xf32>
    %20 = vector.broadcast %19 : vector<1x1x128xf32> to vector<1x16x128xf32>
    %21 = arith.addf %17, %20 : vector<1x16x128xf32>
    %cst_21 = arith.constant 0.000000e+00 : f32
    %22 = vector.broadcast %cst_21 : f32 to vector<1x16x128xf32>
    %23 = arith.maximumf %21, %22 : vector<1x16x128xf32>
    %c0_22 = arith.constant 0 : index
    %c0_23 = arith.constant 0 : index
    %c0_24 = arith.constant 0 : index
    %24 = vector.load %arg6[%c0_22, %c0_23, %c0_24] : memref<1x16x128xf32, #tpu.memory_space<vmem>>, vector<1x16x128xf32>
    tpu.vector_store %arg6[%c0_22, %c0_23, %c0_24], %23 {strides = array<i32>} : memref<1x16x128xf32, #tpu.memory_space<vmem>>, vector<1x16x128xf32>,
    return
  }
  func.func @transform_0(%arg0: i32) -> (i32, i32, i32) {
    %c0_i32 = arith.constant 0 : i32
    %c0_i32_0 = arith.constant 0 : i32
    %c0_i32_1 = arith.constant 0 : i32
    return %arg0, %c0_i32, %c0_i32_0 : i32, i32, i32
  }
  func.func @transform_1(%arg0: i32) -> (i32, i32, i32) {
    %c0_i32 = arith.constant 0 : i32
    %c0_i32_0 = arith.constant 0 : i32
    %c0_i32_1 = arith.constant 0 : i32
    return %arg0, %c0_i32, %c0_i32_0 : i32, i32, i32
  }
  func.func @transform_2(%arg0: i32) -> (i32, i32, i32) {
    %c0_i32 = arith.constant 0 : i32
    %c0_i32_0 = arith.constant 0 : i32
    %c0_i32_1 = arith.constant 0 : i32
    return %arg0, %c0_i32, %c0_i32_0 : i32, i32, i32
  }
  func.func @transform_3(%arg0: i32) -> (i32, i32) {
    %c0_i32 = arith.constant 0 : i32
    %c0_i32_0 = arith.constant 0 : i32
    %c0_i32_1 = arith.constant 0 : i32
    return %c0_i32, %c0_i32_0 : i32, i32
  }
  func.func @transform_4(%arg0: i32) -> (i32, i32) {
    %c0_i32 = arith.constant 0 : i32
    %c0_i32_0 = arith.constant 0 : i32
    %c0_i32_1 = arith.constant 0 : i32
    return %c0_i32, %c0_i32_0 : i32, i32
  }
  func.func @transform_5(%arg0: i32) -> (i32, i32, i32) {
    %c0_i32 = arith.constant 0 : i32
    %c0_i32_0 = arith.constant 0 : i32
    %c0_i32_1 = arith.constant 0 : i32
    return %arg0, %c0_i32, %c0_i32_0 : i32, i32, i32
  }
}

</mosaic_0001>

<bundles_post_ra>
// kernel: tpu_custom_call.1
= control target key start
LH: loop header
LB: loop body
LE: loop exit
PB: predicated region body
PF: predicated region fallthrough
CT: control target
= control target key end

     0   :  { %s1139_s0 = inlined_call_operand.hbm [shape: bf16[2,8,16], index: 0, kind: input, shape index: {}]   ;;  %s1140_s1 = inlined_call_operand.hbm [shape: bf16[2,4,16], index: 1, kind: input, shape index: {}]   ;;  %s1141_s2 = inlined_call_operand.hbm [shape: bf16[2,16,32], index: 2, kind: input, shape index: {}]   ;;  %s1142_s3 = inlined_call_operand.hbm [shape: bf16[32,128], index: 3, kind: input, shape index: {}]   ;;  %s1143_s4 = inlined_call_operand.vmem [shape: f32[1,128], index: 4, kind: input, shape index: {}]   ;;  %s1144_s5 = inlined_call_operand.hbm [shape: f32[2,16,128], index: 5, kind: output, shape index: {}]  }
   0x1   :  { %1148 = sst [smem:[#allocation18_spill]] %s1140_s1 }
   0x2   :  { %1149 = sst [smem:[#allocation19_spill]] %s1142_s3 }
   0x3   :  { %10 = vsyncpa [#allocation4], 0 }
   0x4   :  { %12 = vsyncpa [#allocation4 + $0x1], 0 }
   0x5   :  { %13 = vsyncpa [#allocation7], 0 }
   0x6   :  { %15 = vsyncpa [#allocation7 + $0x1], 0 }
   0x7   :  { %16 = vsyncpa [#allocation10], 0 }
   0x8   :  { %17 = vsyncpa [#allocation5], 0 }
   0x9   :  { %19 = vsyncpa [#allocation5 + $0x1], 0  ;;  %s934_s18 = smov 0   ;;  %s936_s19 = smov 0  }
   0xa   :  { %s938_s20 = smov 0   ;;  %s940_s21 = smov 0  }
   0xb LB: > { %1150 = sst [smem:[#allocation16_spill]] %s892_s20  ;;  %s955_s22 = sadd.s32 4294967295, %s896_s21   ;;  %s896_s21 = sphi %s940_s21, %s1168_s21   ;;  %s892_s20 = sphi %s938_s20, %s1167_s20   ;;  %s888_s19 = sphi %s936_s19, %s1166_s19   ;;  %s884_s18 = sphi %s934_s18, %s1165_s18  }
   0xc   : > { %s582_s23 = sadd.s32 4294967294, %s896_s21   ;;  %s959_s24 = sadd.s32 1, %s896_s21  }
   0xd   : > { %s32_s25 = sadd.s32 1, %s892_s20  ;;  %s29_s26 = ssub.s32 %s896_s21, %s959_s24 }
   0xe   : > { %p39_p0 = scmp.ne.s32.totalorder %s892_s20, %s888_s19  ;;  %p30_p1 = scmp.eq.s32.totalorder %s29_s26, 0 }
   0xf   : > { %p40_p2 = scmp.eq.s32.totalorder %s896_s21, 0  ;;  %p45_p3 = scmp.ne.s32.totalorder %s888_s19, %s884_s18 }
  0x10   : > { %p163_p4 = scmp.eq.s32.totalorder %s955_s22, 1  ;;  %p169_p7 = scmp.eq.s32.totalorder %s582_s23, 1 }
  0x11   : > { %s971_s27 = scalar_select %p30_p1, %s892_s20, %s32_s25  }
  0x12   : > { %p41_p5 = por %p40_p2, %p39_p0  ;;  %p973_p6 = por %p163_p4, %p39_p0 }
  0x13   : > { %1151 = sst [smem:[#allocation17_spill]] %s971_s27  ;;  %p660_p9 = scmp.lt.s32.totalorder %s896_s21, 2 }
  0x14   : > { %p982_p10 = por %p169_p7, %p45_p3  ;;  %s987_s30 = sand.u32 1, %s892_s20  }
  0x15   : > { %p989_p11 = pnand %p660_p9, %p41_p5  ;;  %s225_s7 = sand.u32 1, %s896_s21  }
  0x16   : > { %s588_s8 = sshll.u32 %s987_s30, 1  ;;  %s589_s9 = sshll.u32 %s896_s21, 1 }
  0x17   : > { %s229_s10 = scalar_lea.vmem [#allocation6], %s588_s8  ;;  %s1155_s1 = sld [smem:[#allocation18_spill]] }
  0x18   : > { %s237_s11 = sshll.u32 %s229_s10, 4  ;;  %p46_p12 = scmp.eq.s32.totalorder %s955_s22, 0  ;;  %s238_s11 = int_to_ptr.vmem [resolvable:$true] %s237_s11 }
  0x19   : > { %s1001_s17 = scalar_lea.sflag [#allocation7], %s225_s7  ;;  %p706_p0 = pneg %p989_p11 }
  0x1d   : > { %s233_s14 = scalar_lea.hbm %s1155_s1, %s589_s9  ;;  %s709_s9 = scalar_lea.hbm %s1155_s1, 4 }
  0x1e   : > { %s235_s15 = sshll.u32 %s233_s14, 4  ;;  %s236_s15 = int_to_ptr.hbm [resolvable:$true] %s235_s15 }
  0x1f   : > { %s702_s23 = sshra.s32 %s236_s15, 4  ;;  %s703_s23 = int_to_ptr.hbm [resolvable:$true] %s702_s23 }
  0x20   : > { %s704_s25 = scalar_lea.hbm %s703_s23, 2  ;;  %p710_p4 = scmp.lt.s32.totalorder %s703_s23, %s1155_s1 }
  0x21   : > { %p705_p13 = scmp.ne.s32.totalorder %s703_s23, %s704_s25  ;;  %p711_p5 = scmp.lt.s32.totalorder %s709_s9, %s704_s25 }
  0x23   : > { %p707_p1 = pnand %p706_p0, %p705_p13  ;;  %p712_p7 = por %p711_p5, %p710_p4 }
  0x25   : > { %p708_p2 = pneg %p707_p1 }
  0x27   : > { %p713_p9 = pnand %p712_p7, %p708_p2 }
  0x29   : > { %716 = shalt.err (!%p713_p9)
}
  0x2a   : > { %651 = dma.hbm_to_vmem [thread:$0]  (!%p989_p11), %s236_s15, 32, %s238_s11, %s1001_s17  }
  0x2b   : > { %p1022_p13 = por %p46_p12, %p45_p3  ;;  %p583_p1 = scmp.ge.s32.totalorder %s896_s21, 1 }
  0x2c   : > { %p176_p2 = scmp.lt.s32.totalorder %s896_s21, 3  ;;  %s1157_s3 = sld [smem:[#allocation19_spill]] }
  0x2d   : > { %s898_s26 = smov [#allocation9]   ;;  %s586_s15 = sshll.u32 %s987_s30, 2 }
  0x2e   : > { %p1031_p4 = pnand %p583_p1, %p176_p2  ;;  %s189_s11 = sshll.u32 %s898_s26, 4  ;;  %s190_s11 = int_to_ptr.vmem [resolvable:$true] %s189_s11 }
  0x2f   : > { %s587_s8 = sshll.u32 %s896_s21, 2  ;;  %s210_s9 = scalar_lea.vmem [#allocation3], %s586_s15 }
  0x30   : > { %p641_p3 = pneg %p1031_p4  ;;  %s218_s10 = sshll.u32 %s210_s9, 4  ;;  %s219_s10 = int_to_ptr.vmem [resolvable:$true] %s218_s10 }
  0x31   : > { %s214_s14 = scalar_lea.hbm %s1139_s0, %s587_s8  ;;  %s1146_s16 = smov 64  }
  0x32   : > { %s187_s23 = sshll.u32 %s1157_s3, 4  ;;  %p642_p5 = pnand %p641_p3, %p46_p12  ;;  %s188_s23 = int_to_ptr.hbm [resolvable:$true] %s187_s23 }
  0x33   : > { %s1147_s1 = smov 4   ;;  %s216_s26 = sshll.u32 %s214_s14, 4  ;;  %s217_s26 = int_to_ptr.hbm [resolvable:$true] %s216_s26 }
  0x34   : > { %644 = dma.hbm_to_vmem [thread:$0]  (!%p642_p5), %s188_s23, 256, %s190_s11, [#allocation10], %s1146_s16, %s1146_s16, %s1147_s1  }
  0x35   : > { %s207_s3 = scalar_lea.sflag [#allocation4], %s987_s30  ;;  %s762_s27 = sshra.s32 %s217_s26, 4  ;;  %s763_s27 = int_to_ptr.hbm [resolvable:$true] %s762_s27 }
  0x36   : > { %s764_s20 = scalar_lea.hbm %s763_s27, 4  ;;  %s769_s9 = scalar_lea.hbm %s1139_s0, 8 }
  0x37   : > { %p765_p7 = scmp.ne.s32.totalorder %s763_s27, %s764_s20  ;;  %p770_p2 = scmp.lt.s32.totalorder %s763_s27, %s1139_s0 }
  0x38   : > { %p771_p3 = scmp.lt.s32.totalorder %s769_s9, %s764_s20 }
  0x39   : > { %p767_p9 = pnand %p765_p7, %p706_p0 }
  0x3a   : > { %p772_p5 = por %p771_p3, %p770_p2 }
  0x3b   : > { %p768_p1 = pneg %p767_p9 }
  0x3d   : > { %p773_p8 = pnand %p772_p5, %p768_p1 }
  0x3f   : > { %776 = shalt.err (!%p773_p8)
}
  0x40   : > { %648 = dma.hbm_to_vmem [thread:$0]  (!%p989_p11), %s217_s26, 64, %s219_s10, %s207_s3  }
  0x41   : > { %s623_s23 = sshll.u32 %s896_s21, 3  ;;  %s1159_s11 = sshll.u32 %s987_s30, 3 }
  0x42   : > { %s248_s14 = scalar_lea.vmem [#allocation8], %s1159_s11  ;;  %s253_s1 = scalar_lea.hbm %s1141_s2, %s623_s23 }
  0x43   : > { %s256_s16 = sshll.u32 %s248_s14, 4  ;;  %s254_s27 = sshll.u32 %s253_s1, 4  ;;  %s257_s16 = int_to_ptr.vmem [resolvable:$true] %s256_s16  ;;  %s255_s27 = int_to_ptr.hbm [resolvable:$true] %s254_s27 }
  0x44   : > { %s792_s20 = sshra.s32 %s255_s27, 4  ;;  %s799_s30 = scalar_lea.hbm %s1141_s2, 16  ;;  %s793_s20 = int_to_ptr.hbm [resolvable:$true] %s792_s20 }
  0x45   : > { %s794_s9 = scalar_lea.hbm %s793_s20, 8  ;;  %p800_p1 = scmp.lt.s32.totalorder %s793_s20, %s1141_s2 }
  0x46   : > { %p795_p8 = scmp.ne.s32.totalorder %s793_s20, %s794_s9  ;;  %p801_p2 = scmp.lt.s32.totalorder %s799_s30, %s794_s9 }
  0x48   : > { %p797_p7 = pnand %p795_p8, %p706_p0  ;;  %p802_p3 = por %p801_p2, %p800_p1 }
  0x4a   : > { %p798_p9 = pneg %p797_p7 }
  0x4c   : > { %p803_p5 = pnand %p802_p3, %p798_p9 }
  0x4e   : > { %806 = shalt.err (!%p803_p5)
}
  0x4f   : > { %s1160_s1 = smov 4   ;;  %s1161_s13 = smov 64  }
  0x50   : > { %654 = dma.hbm_to_vmem [thread:$0]  (!%p989_p11), %s255_s27, 128, %s257_s16, %s1001_s17, %s1161_s13, %s1161_s13, %s1160_s1  }
  0x51   : > { %268 = sbr.rel (%p1031_p4) target bundleno = 382 (0x17e), region = 40  ;;  %s1083_s23 = sand.u32 (!%p1031_p4), 1, %s888_s19  }
  0x52   : > { %s594_s11 = sshll.u32 (!%p1031_p4), %s1083_s23, 2  ;;  %s271_s14 = scalar_lea.sflag (!%p1031_p4), [#allocation4], %s1083_s23 }
  0x53   : > { %s274_s15 = scalar_lea.vmem (!%p1031_p4), [#allocation3], %s594_s11 }
  0x56   : > { %867 = dma.done.wait (%p1022_p13), %s271_s14, 64  }
  0x57   : > { %869 = vsyncadd (%p1022_p13), %s271_s14, 4294967232  ;;  %s280_s6 = sand.u32 1, %s955_s22   ;;  %s595_s16 = sshll.u32 %s1083_s23, 1 }
  0x58   : > { %s281_s17 = scalar_lea.sflag [#allocation7], %s280_s6  ;;  %s284_s25 = scalar_lea.vmem [#allocation6], %s595_s16 }
  0x59   : > { %871 = dma.done.wait (%p1022_p13), %s281_s17, 160  }
  0x5a   : > { %873 = vsyncadd (%p1022_p13), %s281_s17, 4294967136  ;;  %s596_s8 = sshll.u32 %s1083_s23, 3 }
  0x5b   : > { %s294_s27 = scalar_lea.vmem [#allocation8], %s596_s8 }
  0x5c   : > { %875 = dma.done.wait (%p46_p12), [#allocation10], 256  }
  0x5d   : > { %877 = vsyncadd (%p46_p12), [#allocation10], 4294967040  ;;  %v624_v0 = vld [vmem:[%s294_s27] sm:$0xff]  ;;  %v340_v1 = vld [vmem:[%s274_s15] sm:$0xf]  ;;  %vm347_vm0 = vcmask 130048  }
  0x5e   : > { %358 = vmatpush.bf16.msra.mxu0 %v624_v0  ;;  %375 = vmatpush.bf16.msra.mxu1 %v624_v0  ;;  %v364_v2 = vld [vmem:[%s284_s25] sm:$0x3]  ;;  %vm387_vm1 = vcmask 257026   ;;  %v901_v4 = vmov 0   ;;  %v626_v5 = vld [vmem:[#allocation9] sm:$0xff]  ;;  %vm382_vm2 = vcmask 257024  }
  0x5f   : > { %v627_v3 = vld [vmem:[#allocation9 + $0x8] sm:$0xff]  ;;  %388 = vst.msk [vmem:[#allocation2 + $0x4] sm:$0xc] %vm387_vm1, %v901_v4  ;;  %vm385_vm3 = vcmask 254976   ;;  %vm412_vm4 = vcmask 261120   ;;  %s598_s9 = sshll.u32 %s1083_s23, 4 }
  0x60   : > { %422 = vmatpush.bf16.msra.mxu2 %v627_v3  ;;  %v701_v13 = vld [vmem:[%s1143_s4] ss:$0 sm:$0xff]  ;;  %s628_s3 = sshll.u32 %s955_s22, 4  ;;  %s336_s12 = scalar_lea.vmem [#allocation11], %s598_s9 }
  0x61   : > { %603 = vmatmul.msk.bf16.vlgmr.msra.gmra.mxu0 %vm347_vm0, %v340_v1  ;;  %604 = vmatmul.msk.bf16.vlgmr.msra.gmra.mxu1 %vm347_vm0, %v364_v2  ;;  %s452_s26 = scalar_lea.hbm %s1144_s5, %s628_s3  ;;  %s453_s1 = sshll.u32 %s336_s12, 4  ;;  %s454_s1 = int_to_ptr.vmem [resolvable:$true] %s453_s1 }
  0x62   : > { %s455_s13 = sshll.u32 %s452_s26, 4  ;;  %s441_s11 = scalar_lea.sflag [#allocation5], %s1083_s23  ;;  %s456_s13 = int_to_ptr.hbm [resolvable:$true] %s455_s13 }
  0x63   : > { %s836_s14 = sshra.s32 %s456_s13, 4  ;;  %s842_s16 = scalar_lea.hbm %s1144_s5, 32  ;;  %s837_s14 = int_to_ptr.hbm [resolvable:$true] %s836_s14 }
  0x64   : > { %423 = vmatpush.bf16.msra.mxu2 %v626_v5  ;;  %s838_s22 = scalar_lea.hbm %s837_s14, 16  ;;  %p843_p13 = scmp.lt.s32.totalorder %s837_s14, %s1144_s5 }
  0x65   : > { %p839_p11 = scmp.ne.s32.totalorder %s837_s14, %s838_s22  ;;  %p844_p4 = scmp.lt.s32.totalorder %s842_s16, %s838_s22 }
  0x67   : > { %p840_p12 = pnand %p839_p11, %p973_p6  ;;  %p845_p8 = por %p844_p4, %p843_p13 }
  0x69   : > { %p841_p0 = pneg %p840_p12 }
  0x6b   : > { %p846_p7 = pnand %p845_p8, %p841_p0 }
  0xde   : > { %v360_v6 = vpop.f32.mrf.mxu0  ;;  %v377_v7 = vpop.f32.mrf.mxu1 }
  0xdf   : > { %v381_v8 = vpack.c.bf16 %v360_v6, %v360_v6  ;;  %v384_v9 = vpack.c.bf16 %v377_v7, %v377_v7 }
  0xe1   : > { %383 = vst.msk [vmem:[#allocation2] sm:$0xf] %vm382_vm2, %v381_v8 }
  0xe2   : > { %386 = vst.msk [vmem:[#allocation2 + $0x4] sm:$0x3] %vm385_vm3, %v384_v9 }
  0xe6   : > { %v362_v10 = vpop.f32.mrf.mxu0  ;;  %v379_v11 = vpop.f32.mrf.mxu1 }
  0xe9   : > { %v625_v12 = vld [vmem:[#allocation2] sm:$0xff] }
  0xea   : > { %617 = vmatmul.msk.bf16.vlgmr.msra.gmra.mxu2 %vm412_vm4, %v625_v12 }
 0x16d   : > { %v425_v14 = vpop.f32.mrf.mxu2 }
 0x16e   : > { %v434_v15 = vadd.f32 %v701_v13, %v425_v14 }
 0x170   : > { %v436_v16 = vmax.f32 %v434_v15, 0.0 }
 0x172   : > { %438 = vst [vmem:[%s336_s12] sm:$0xff] %v436_v16 }
 0x175   : > { %v427_v17 = vpop.f32.mrf.mxu2 }
 0x176   : > { %v435_v18 = vadd.f32 %v701_v13, %v427_v17 }
 0x178   : > { %v437_v19 = vmax.f32 %v435_v18, 0.0 }
 0x17a   : > { %439 = vst [vmem:[%s336_s12 + $0x8] sm:$0xff] %v437_v19 }
 0x17b   : > { %849 = shalt.err (!%p846_p7)
}
 0x17c   : > { %s902_s23 = smov 128   ;;  %s903_s8 = smov 8  }
 0x17d   : > { %639 = dma.vmem_to_hbm [thread:$0]  (%p973_p6), %s454_s1, 256, %s456_s13, %s441_s11, %s902_s23, %s902_s23, %s903_s8  }
 0x17e PF: > { %s470_s27 = sand.u32 1, %s884_s18   ;;  %p1162_p9 = scmp.ge.s32.totalorder %s896_s21, 2 }
 0x17f   : > { %s471_s7 = scalar_lea.sflag [#allocation5], %s470_s27 }
 0x180   : > { %p656_p1 = pnand %p1162_p9, %p982_p10 }
 0x182   : > { %p657_p2 = pneg %p656_p1 }
 0x184   : > { %879 = dma.done.wait (%p657_p2), %s471_s7, 256  }
 0x185   : > { %881 = vsyncadd (%p657_p2), %s471_s7, 4294967040  ;;  %s1163_s20 = sld [smem:[#allocation16_spill]]  ;;  %p22_p3 = scmp.ge.s32.totalorder %s959_s24, 4  }
 0x186   : > { %s1164_s9 = sld [smem:[#allocation17_spill]]  ;;  %s1165_s18 = smov %s888_s19 }
 0x187   : > { %s1168_s21 = smov %s959_s24 }
 0x188   :  { %24 = sbr.rel (!%p22_p3) target bundleno = 11 (0xb), region = 113 }
 0x18b   : > { %s1166_s19 = smov %s1163_s20 }
 0x18c   : > { %s1167_s20 = smov %s1164_s9 }
 0x18d   :  { %477 = vsyncpa [#allocation4], 1 }
 0x18e   :  { %479 = vsyncpa [#allocation4 + $0x1], 1 }
 0x18f   :  { %480 = vsyncpa [#allocation7], 1 }
 0x190   :  { %482 = vsyncpa [#allocation7 + $0x1], 1 }
 0x191   :  { %483 = vsyncpa [#allocation10], 1 }
 0x192   :  { %484 = vsyncpa [#allocation5], 1 }
 0x193   :  { %486 = vsyncpa [#allocation5 + $0x1], 1 }

</bundles_post_ra>
